<compile_context>
chip_gen: v5e
topology: v5e:2x2
jax: 0.10.0
libtpu: 0.0.40
codegen_flags: <defaults>
</compile_context>

<pallas_src>
import functools
import math

import jax
import jax.numpy as jnp
from jax.experimental import pallas as pl
from jax.experimental.pallas import tpu as pltpu


def _posenc_kernel(x_ref, pe_ref, o_ref, *, scale):
    # x_ref : (1, TS, D) block of the (N, S, D) input
    # pe_ref: (TS, D) block of the positional-encoding table (batch-invariant)
    o_ref[...] = x_ref[...] * scale + pe_ref[...]


def _seq_tile(s):
    # Largest tile that divides S and respects the (8, 128) sublane rule;
    # fall back to the full extent (a full-dim block is always legal).
    for t in (1024, 512, 256, 128, 64, 32, 16, 8):
        if s % t == 0:
            return t
    return s


def positional_encoding_forward(x, pe, *, d_model):
    """Pallas implementation of PositionalEncoding.forward (eval mode).

    x : (N, 1, S, 1, D) float32  -- what the surrounding model (embedding) feeds it
    pe: (1, max_len, d_model) float32 buffer; S == max_len, D <= d_model
    returns (N, S, D) float32
    """
    # x = x.squeeze(3); x = x.squeeze(1)      -- metadata only, free
    x = jnp.squeeze(jnp.squeeze(x, axis=3), axis=1)            # (N, S, D)
    N, S, D = x.shape
    # y = self.pe[:, :, :x.size(2)]; y.squeeze()
    pe_used = pe[0, :, :D]                                     # (max_len, D)
    assert pe_used.shape[0] == S, "seq length must equal max_len for the += broadcast"

    ts = _seq_tile(S)
    scale = float(math.sqrt(d_model))                          # uses self.d_model

    out = pl.pallas_call(
        functools.partial(_posenc_kernel, scale=scale),
        out_shape=jax.ShapeDtypeStruct((N, S, D), jnp.float32),
        grid=(N, S // ts),
        in_specs=[pl.BlockSpec((1, ts, D), lambda i, j: (i, j, 0)),
                  pl.BlockSpec((ts, D), lambda i, j: (j, 0))],
        out_specs=pl.BlockSpec((1, ts, D), lambda i, j: (i, j, 0)),
        compiler_params=pltpu.CompilerParams(
            dimension_semantics=("parallel", "parallel")),
    )(x.astype(jnp.float32), pe_used.astype(jnp.float32))
    # TODO(synk): nn.Dropout(p=0.1) is identity in eval mode; training-mode
    # dropout (pltpu.prng_seed + stateful_bernoulli) is intentionally omitted.
    return out


def build_pe(d_model, max_len=250):
    """The torch buffer pe[(1, max_len, d_model)]: sin on even cols, cos on odd."""
    pos = jnp.arange(max_len, dtype=jnp.float32)[:, None]
    div = jnp.exp(jnp.arange(0, d_model, 2, dtype=jnp.float32)
                  * (-math.log(10000.0) / d_model))
    pe = jnp.zeros((max_len, d_model), jnp.float32)
    pe = pe.at[:, 0::2].set(jnp.sin(pos * div))
    pe = pe.at[:, 1::2].set(jnp.cos(pos * div))
    return pe[None]                                            # (1, max_len, d_model)


if __name__ == "__main__":
    # Small shapes consistent with the module: even, lane-dense d_model and a
    # sequence dim equal to max_len (required by the `x += y.squeeze()` broadcast).
    N, d_model, max_len = 2, 128, 128

    key = jax.random.PRNGKey(0)
    # Input mirrors what the model hands PositionalEncoding: (N, 1, S, 1, d_model),
    # i.e. an embedding output whose dims 1 and 3 get squeezed inside forward().
    x = jax.random.normal(key, (N, 1, max_len, 1, d_model), jnp.float32)
    pe = build_pe(d_model, max_len)

    fwd = jax.jit(functools.partial(positional_encoding_forward, d_model=d_model))
    out = jax.block_until_ready(fwd(x, pe))

    # Pure-JAX reference of the forward semantics (eval mode).
    ref = jnp.squeeze(jnp.squeeze(x, 3), 1) * math.sqrt(d_model) + pe[0]
    assert out.shape == (N, max_len, d_model), out.shape
    assert bool(jnp.all(jnp.isfinite(out)))
    assert bool(jnp.allclose(out, ref, atol=1e-4, rtol=1e-5))
    print("KERNEL_OK")
</pallas_src>

<mosaic_0001>
module attributes {stable_mosaic.version = 11 : i64} {
  func.func @_posenc_kernel(%arg0: i32, %arg1: i32, %arg2: memref<1x128x128xf32, #tpu.memory_space<vmem>>, %arg3: memref<128x128xf32, #tpu.memory_space<vmem>>, %arg4: memref<1x128x128xf32, #tpu.memory_space<vmem>>) attributes {dimension_semantics = [#tpu.dimension_semantics<parallel>, #tpu.dimension_semantics<parallel>], iteration_bounds = array<i64: 2, 1>, scalar_prefetch = 0 : i64, scratch_operands = 0 : i64, tpu.core_type = #tpu.core_type<tc>, window_params = [{transform_indices = @transform_0, window_bounds = array<i64: 1, 128, 128>}, {transform_indices = @transform_1, window_bounds = array<i64: 128, 128>}, {transform_indices = @transform_2, window_bounds = array<i64: 1, 128, 128>}]} {
    %c0 = arith.constant 0 : index
    %c0_0 = arith.constant 0 : index
    %c0_1 = arith.constant 0 : index
    %0 = vector.load %arg2[%c0, %c0_0, %c0_1] : memref<1x128x128xf32, #tpu.memory_space<vmem>>, vector<1x128x128xf32>
    %cst = arith.constant 11.3137083 : f32
    %1 = vector.broadcast %cst : f32 to vector<1x128x128xf32>
    %2 = arith.mulf %0, %1 : vector<1x128x128xf32>
    %c0_2 = arith.constant 0 : index
    %c0_3 = arith.constant 0 : index
    %3 = vector.load %arg3[%c0_2, %c0_3] : memref<128x128xf32, #tpu.memory_space<vmem>>, vector<128x128xf32>
    %4 = vector.shape_cast %3 : vector<128x128xf32> to vector<1x128x128xf32>
    %5 = arith.addf %2, %4 : vector<1x128x128xf32>
    %c0_4 = arith.constant 0 : index
    %c0_5 = arith.constant 0 : index
    %c0_6 = arith.constant 0 : index
    %6 = vector.load %arg4[%c0_4, %c0_5, %c0_6] : memref<1x128x128xf32, #tpu.memory_space<vmem>>, vector<1x128x128xf32>
    tpu.vector_store %arg4[%c0_4, %c0_5, %c0_6], %5 {strides = array<i32>} : memref<1x128x128xf32, #tpu.memory_space<vmem>>, vector<1x128x128xf32>,
    return
  }
  func.func @transform_0(%arg0: i32, %arg1: i32) -> (i32, i32, i32) {
    %c0_i32 = arith.constant 0 : i32
    %c0_i32_0 = arith.constant 0 : i32
    return %arg0, %arg1, %c0_i32 : i32, i32, i32
  }
  func.func @transform_1(%arg0: i32, %arg1: i32) -> (i32, i32) {
    %c0_i32 = arith.constant 0 : i32
    %c0_i32_0 = arith.constant 0 : i32
    return %arg1, %c0_i32 : i32, i32
  }
  func.func @transform_2(%arg0: i32, %arg1: i32) -> (i32, i32, i32) {
    %c0_i32 = arith.constant 0 : i32
    %c0_i32_0 = arith.constant 0 : i32
    return %arg0, %arg1, %c0_i32 : i32, i32, i32
  }
}

</mosaic_0001>

<bundles_post_ra>
// kernel: positional_encoding_forward.1
= control target key start
LH: loop header
LB: loop body
LE: loop exit
PB: predicated region body
PF: predicated region fallthrough
CT: control target
= control target key end

     0   :  { %7 = vsyncpa [#allocation3], 0  ;;  %s863_s0 = inlined_call_operand.hbm [shape: f32[2,128,128], index: 0, kind: input, shape index: {}]   ;;  %s864_s1 = inlined_call_operand.hbm [shape: f32[128,128], index: 1, kind: input, shape index: {}]   ;;  %s865_s2 = inlined_call_operand.hbm [shape: f32[2,128,128], index: 2, kind: output, shape index: {}]  }
   0x1   :  { %9 = vsyncpa [#allocation3 + $0x1], 0 }
   0x2   :  { %10 = vsyncpa [#allocation6], 0 }
   0x3   :  { %11 = vsyncpa [#allocation4], 0 }
   0x4   :  { %13 = vsyncpa [#allocation4 + $0x1], 0  ;;  %s671_s9 = smov 0   ;;  %s673_s10 = smov 0  }
   0x5   :  { %s675_s11 = smov 0   ;;  %s677_s12 = smov 0  }
   0x6   :  { %s679_s13 = smov 0   ;;  %s681_s14 = smov 0  }
   0x7 LB: > { %s407_s15 = sadd.s32 4294967295, %s649_s14   ;;  %s408_s16 = sadd.s32 4294967294, %s649_s14   ;;  %s649_s14 = sphi %s681_s14, %s19_s14   ;;  %s645_s13 = sphi %s679_s13, %s877_s13   ;;  %s641_s12 = sphi %s677_s12, %s876_s12   ;;  %s637_s11 = sphi %s675_s11, %s875_s11   ;;  %s633_s10 = sphi %s673_s10, %s874_s10   ;;  %s629_s9 = sphi %s671_s9, %s873_s9  }
   0x8   : > { %p53_p0 = scmp.ne.s32.totalorder %s633_s10, %s629_s9  ;;  %p705_p1 = scmp.eq.s32.totalorder %s407_s15, 0 }
   0x9   : > { %p709_p2 = scmp.eq.s32.totalorder %s407_s15, 1  ;;  %p111_p3 = scmp.eq.s32.totalorder %s408_s16, 1 }
   0xa   : > { %p715_p4 = por %p705_p1, %p53_p0  ;;  %p409_p5 = scmp.ge.s32.totalorder %s649_s14, 1 }
   0xb   : > { %p720_p6 = por %p111_p3, %p53_p0  ;;  %p118_p7 = scmp.lt.s32.totalorder %s649_s14, 3 }
   0xc   : > { %s132_s23 = sshll.u32 %s864_s1, 4  ;;  %s651_s25 = smov [#allocation5]   ;;  %s133_s23 = int_to_ptr.hbm [resolvable:$true] %s132_s23 }
   0xd   : > { %p728_p8 = pnand %p409_p5, %p118_p7  ;;  %s134_s26 = sshll.u32 %s651_s25, 4  ;;  %s135_s26 = int_to_ptr.vmem [resolvable:$true] %s134_s26 }
   0xe   : > { %p411_p11 = scmp.ge.s32.totalorder %s649_s14, 2  ;;  %s652_s27 = smov 128  }
   0xf   : > { %p434_p9 = pneg %p728_p8  ;;  %s653_s28 = smov 8  }
  0x10   : > { %s31_s29 = sadd.s32 1, %s645_s13  ;;  %s40_s30 = sadd.s32 1, %s637_s11 }
  0x11   : > { %p435_p10 = pnand %p434_p9, %p705_p1  ;;  %p33_p12 = scmp.ge.s32.totalorder %s31_s29, 2 }
  0x12   : > { %p47_p13 = scmp.ne.s32.totalorder %s637_s11, %s633_s10  ;;  %p48_p0 = scmp.eq.s32.totalorder %s649_s14, 0 }
  0x13   : > { %437 = dma.hbm_to_vmem [thread:$0]  (!%p435_p10), %s133_s23, 2048, %s135_s26, [#allocation6], %s652_s27, %s652_s27, %s653_s28  }
  0x14   : > { %s879_s29 = smov (%p33_p12, %s31_s29), 0  ;;  %p747_p3 = por %p48_p0, %p47_p13 }
  0x15   : > { %p753_p5 = por %p709_p2, %p47_p13  ;;  %s35_s5 = ssub.s32 %s645_s13, %s879_s29 }
  0x16   : > { %p447_p7 = scmp.lt.s32.totalorder %s649_s14, 2  ;;  %p38_p9 = scmp.eq.s32.totalorder %s35_s5, 0 }
  0x17   : > { %s148_s6 = sand.u32 1, %s637_s11   ;;  %s424_s15 = sshll.u32 %s645_s13, 7 }
  0x18   : > { %s412_s7 = sshll.u32 %s148_s6, 7  ;;  %s159_s22 = scalar_lea.hbm %s863_s0, %s424_s15 }
  0x19   : > { %s762_s8 = scalar_select %p38_p9, %s637_s11, %s40_s30  }
  0x1a   : > { %s152_s23 = scalar_lea.vmem [#allocation2], %s412_s7  ;;  %s160_s18 = sshll.u32 %s159_s22, 4  ;;  %s161_s18 = int_to_ptr.hbm [resolvable:$true] %s160_s18 }
  0x1b   : > { %s162_s25 = sshll.u32 %s152_s23, 4  ;;  %p439_p2 = pnand %p447_p7, %p747_p3  ;;  %s163_s25 = int_to_ptr.vmem [resolvable:$true] %s162_s25 }
  0x1c   : > { %s149_s26 = scalar_lea.sflag [#allocation3], %s148_s6  ;;  %174 = sbr.rel (%p728_p8) target bundleno = 60 (0x3c), region = 28 }
  0x1d   : > { %441 = dma.hbm_to_vmem [thread:$0]  (!%p439_p2), %s161_s18, 2048, %s163_s25, %s149_s26, %s652_s27, %s652_s27, %s653_s28  }
  0x1e   : > { %s776_s30 = sand.u32 (!%p728_p8), 1, %s633_s10  }
  0x1f   : > { %s416_s5 = sshll.u32 (!%p728_p8), %s776_s30, 7  ;;  %s177_s7 = scalar_lea.sflag (!%p728_p8), [#allocation3], %s776_s30 }
  0x20   : > { %s780_s15 = scalar_lea.vmem (!%p728_p8), [#allocation2], %s416_s5 }
  0x21   : > { %616 = dma.done.wait (%p715_p4), %s177_s7, 2048  }
  0x22   : > { %618 = vsyncadd (%p715_p4), %s177_s7, 4294965248 }
  0x23   : > { %620 = dma.done.wait (%p705_p1), [#allocation6], 2048  }
  0x24   : > { %622 = vsyncadd (%p705_p1), [#allocation6], 4294965248  ;;  %v210_v0 = vld [vmem:[%s780_s15] sm:$0xff]  ;;  %v211_v2 = vld [vmem:[%s780_s15 + $0x8] sm:$0xff]  ;;  %s797_s17 = scalar_lea.vmem [#allocation7], %s416_s5  ;;  %s425_s19 = sshll.u32 %s641_s12, 7 }
  0x25   : > { %v242_v1 = vld [vmem:[#allocation5] sm:$0xff]  ;;  %v226_v3 = vmul.f32 11.313708, %v210_v0  ;;  %v227_v4 = vmul.f32 11.313708, %v211_v2  ;;  %v243_v5 = vld [vmem:[#allocation5 + $0x8] sm:$0xff]  ;;  %s304_s27 = scalar_lea.hbm %s865_s2, %s425_s19 }
  0x26   : > { %v212_v6 = vld [vmem:[%s780_s15 + $0x10] sm:$0xff]  ;;  %v213_v9 = vld [vmem:[%s780_s15 + $0x18] sm:$0xff]  ;;  %v214_v14 = vld [vmem:[%s780_s15 + $0x20] sm:$0xff]  ;;  %s305_s28 = sshll.u32 %s797_s17, 4  ;;  %s307_s3 = sshll.u32 %s304_s27, 4  ;;  %s306_s28 = int_to_ptr.vmem [resolvable:$true] %s305_s28  ;;  %s308_s3 = int_to_ptr.hbm [resolvable:$true] %s307_s3 }
  0x27   : > { %v228_v7 = vmul.f32 11.313708, %v212_v6  ;;  %v244_v8 = vld [vmem:[#allocation5 + $0x10] sm:$0xff]  ;;  %v245_v10 = vld [vmem:[#allocation5 + $0x18] sm:$0xff]  ;;  %v258_v11 = vadd.f32 %v242_v1, %v226_v3  ;;  %v259_v12 = vadd.f32 %v243_v5, %v227_v4  ;;  %v229_v13 = vmul.f32 11.313708, %v213_v9 }
  0x28   : > { %v246_v15 = vld [vmem:[#allocation5 + $0x20] sm:$0xff]  ;;  %v215_v16 = vld [vmem:[%s780_s15 + $0x28] sm:$0xff]  ;;  %v230_v18 = vmul.f32 11.313708, %v214_v14  ;;  %v216_v21 = vld [vmem:[%s780_s15 + $0x30] sm:$0xff]  ;;  %s291_s6 = scalar_lea.sflag [#allocation4], %s776_s30 }
  0x29   : > { %v260_v17 = vadd.f32 %v244_v8, %v228_v7  ;;  %v231_v19 = vmul.f32 11.313708, %v215_v16  ;;  %v247_v20 = vld [vmem:[#allocation5 + $0x28] sm:$0xff]  ;;  %274 = vst [vmem:[%s797_s17] sm:$0xff] %v258_v11  ;;  %v261_v22 = vadd.f32 %v245_v10, %v229_v13  ;;  %v232_v23 = vmul.f32 11.313708, %v216_v21  ;;  %v248_v24 = vld [vmem:[#allocation5 + $0x30] sm:$0xff] }
  0x2a   : > { %v217_v25 = vld [vmem:[%s780_s15 + $0x38] sm:$0xff]  ;;  %275 = vst [vmem:[%s797_s17 + $0x8] sm:$0xff] %v259_v12  ;;  %v262_v27 = vadd.f32 %v246_v15, %v230_v18  ;;  %v218_v30 = vld [vmem:[%s780_s15 + $0x40] sm:$0xff]  ;;  %v219_v32 = vld [vmem:[%s780_s15 + $0x48] sm:$0xff]  ;;  %s577_s16 = sshra.s32 %s308_s3, 4  ;;  %s583_s25 = scalar_lea.hbm %s865_s2, 256  ;;  %s578_s16 = int_to_ptr.hbm [resolvable:$true] %s577_s16 }
  0x2b   : > { %v249_v26 = vld [vmem:[#allocation5 + $0x38] sm:$0xff]  ;;  %v263_v28 = vadd.f32 %v247_v20, %v231_v19  ;;  %v233_v29 = vmul.f32 11.313708, %v217_v25  ;;  %v250_v31 = vld [vmem:[#allocation5 + $0x40] sm:$0xff]  ;;  %276 = vst [vmem:[%s797_s17 + $0x10] sm:$0xff] %v260_v17  ;;  %v264_v33 = vadd.f32 %v248_v24, %v232_v23  ;;  %v251_v36 = vld [vmem:[#allocation5 + $0x48] sm:$0xff]  ;;  %p584_p10 = scmp.lt.s32.totalorder %s578_s16, %s865_s2 }
  0x2c   : > { %v234_v34 = vmul.f32 11.313708, %v218_v30  ;;  %v235_v35 = vmul.f32 11.313708, %v219_v32  ;;  %277 = vst [vmem:[%s797_s17 + $0x18] sm:$0xff] %v261_v22  ;;  %v220_v38 = vld [vmem:[%s780_s15 + $0x50] sm:$0xff] }
  0x2d   : > { %v265_v37 = vadd.f32 %v249_v26, %v233_v29  ;;  %v252_v39 = vld [vmem:[#allocation5 + $0x50] sm:$0xff]  ;;  %v221_v40 = vld [vmem:[%s780_s15 + $0x58] sm:$0xff]  ;;  %278 = vst [vmem:[%s797_s17 + $0x20] sm:$0xff] %v262_v27  ;;  %v236_v42 = vmul.f32 11.313708, %v220_v38  ;;  %v222_v46 = vld [vmem:[%s780_s15 + $0x60] sm:$0xff] }
  0x2e   : > { %v266_v41 = vadd.f32 %v250_v31, %v234_v34  ;;  %v237_v43 = vmul.f32 11.313708, %v221_v40  ;;  %v253_v44 = vld [vmem:[#allocation5 + $0x58] sm:$0xff]  ;;  %279 = vst [vmem:[%s797_s17 + $0x28] sm:$0xff] %v263_v28  ;;  %v267_v45 = vadd.f32 %v251_v36, %v235_v35  ;;  %v254_v47 = vld [vmem:[#allocation5 + $0x60] sm:$0xff]  ;;  %v223_v48 = vld [vmem:[%s780_s15 + $0x68] sm:$0xff] }
  0x2f   : > { %280 = vst [vmem:[%s797_s17 + $0x30] sm:$0xff] %v264_v33  ;;  %v268_v49 = vadd.f32 %v252_v39, %v236_v42  ;;  %v238_v50 = vmul.f32 11.313708, %v222_v46  ;;  %v239_v51 = vmul.f32 11.313708, %v223_v48  ;;  %v255_v52 = vld [vmem:[#allocation5 + $0x68] sm:$0xff] }
  0x30   : > { %281 = vst [vmem:[%s797_s17 + $0x38] sm:$0xff] %v265_v37  ;;  %v269_v53 = vadd.f32 %v253_v44, %v237_v43  ;;  %v224_v54 = vld [vmem:[%s780_s15 + $0x70] sm:$0xff]  ;;  %v225_v56 = vld [vmem:[%s780_s15 + $0x78] sm:$0xff]  ;;  %s579_s21 = scalar_lea.hbm %s578_s16, 128 }
  0x31   : > { %v256_v55 = vld [vmem:[#allocation5 + $0x70] sm:$0xff]  ;;  %282 = vst [vmem:[%s797_s17 + $0x40] sm:$0xff] %v266_v41  ;;  %v270_v57 = vadd.f32 %v254_v47, %v238_v50  ;;  %v240_v58 = vmul.f32 11.313708, %v224_v54  ;;  %v241_v59 = vmul.f32 11.313708, %v225_v56  ;;  %v271_v61 = vadd.f32 %v255_v52, %v239_v51  ;;  %p580_p1 = scmp.ne.s32.totalorder %s578_s16, %s579_s21  ;;  %p585_p12 = scmp.lt.s32.totalorder %s583_s25, %s579_s21 }
  0x32   : > { %v257_v60 = vld [vmem:[#allocation5 + $0x78] sm:$0xff]  ;;  %283 = vst [vmem:[%s797_s17 + $0x48] sm:$0xff] %v267_v45 }
  0x33   : > { %284 = vst [vmem:[%s797_s17 + $0x50] sm:$0xff] %v268_v49  ;;  %v272_v62 = vadd.f32 %v256_v55, %v240_v58  ;;  %v273_v63 = vadd.f32 %v257_v60, %v241_v59  ;;  %p581_p4 = pnand %p580_p1, %p753_p5  ;;  %p586_p13 = por %p585_p12, %p584_p10 }
  0x34   : > { %285 = vst [vmem:[%s797_s17 + $0x58] sm:$0xff] %v269_v53 }
  0x35   : > { %286 = vst [vmem:[%s797_s17 + $0x60] sm:$0xff] %v270_v57  ;;  %p582_p8 = pneg %p581_p4 }
  0x36   : > { %287 = vst [vmem:[%s797_s17 + $0x68] sm:$0xff] %v271_v61 }
  0x37   : > { %288 = vst [vmem:[%s797_s17 + $0x70] sm:$0xff] %v272_v62  ;;  %p587_p0 = pnand %p586_p13, %p582_p8 }
  0x38   : > { %289 = vst [vmem:[%s797_s17 + $0x78] sm:$0xff] %v273_v63 }
  0x39   : > { %590 = shalt.err (!%p587_p0)
}
  0x3a   : > { %s654_s30 = smov 128   ;;  %s655_s5 = smov 8  }
  0x3b   : > { %432 = dma.vmem_to_hbm [thread:$0]  (%p753_p5), %s306_s28, 2048, %s308_s3, %s291_s6, %s654_s30, %s654_s30, %s655_s5  }
  0x3c PF: > { %s322_s7 = sand.u32 1, %s629_s9   ;;  %p443_p3 = pnand %p411_p11, %p720_p6 }
  0x3d   : > { %s323_s15 = scalar_lea.sflag [#allocation4], %s322_s7 }
  0x3e   : > { %p444_p7 = pneg %p443_p3 }
  0x40   : > { %624 = dma.done.wait (%p444_p7), %s323_s15, 2048  }
  0x41   : > { %626 = vsyncadd (%p444_p7), %s323_s15, 4294965248  ;;  %s19_s14 = sadd.s32 1, %s649_s14   ;;  %s873_s9 = smov %s633_s10 }
  0x42   : > { %p16_p9 = scmp.ge.s32.totalorder %s19_s14, 4   ;;  %s874_s10 = smov %s637_s11 }
  0x43   : > { %s875_s11 = smov %s762_s8  ;;  %s876_s12 = smov %s645_s13 }
  0x44   : > { %s877_s13 = smov %s879_s29  ;;  %18 = sbr.rel (!%p16_p9) target bundleno = 7 (0x7), region = 78 }
  0x49   :  { %329 = vsyncpa [#allocation3], 1 }
  0x4a   :  { %331 = vsyncpa [#allocation3 + $0x1], 1 }
  0x4b   :  { %332 = vsyncpa [#allocation6], 1 }
  0x4c   :  { %333 = vsyncpa [#allocation4], 1 }
  0x4d   :  { %335 = vsyncpa [#allocation4 + $0x1], 1 }

</bundles_post_ra>
